<compile_context>
chip_gen: v7x
topology: tpu7x:2x2x1
jax: 0.10.0
libtpu: 0.0.40
codegen_flags: <defaults>
</compile_context>

<pallas_src>
import jax
import jax.numpy as jnp
from jax.experimental import pallas as pl
from jax.experimental.pallas import tpu as pltpu


# -----------------------------------------------------------------------------
# Pallas kernel: one LSTM step (tile 0 only) + per-tile output projection
# -----------------------------------------------------------------------------
def _decoder_step_kernel(
    emb_ref,      # (B, E)           bf16  embedded tokens (after dropout)
    ctx_ref,      # (B, He)          bf16  context
    h_ref,        # (B, Hd)          f32   previous hidden
    c_ref,        # (B, Hd)          f32   previous cell
    wih_e_ref,    # (E,  4*Hd)       bf16  W_ih^T rows for the embedded part
    wih_c_ref,    # (He, 4*Hd)       bf16  W_ih^T rows for the context part
    whh_ref,      # (Hd, 4*Hd)       bf16  W_hh^T
    b_ref,        # (1,  4*Hd)       f32   b_ih + b_hh (pre-folded)
    wfc_ref,      # (E+He+Hd, TILE_O) bf16 W_fc^T (streamed vocab tile)
    bfc_ref,      # (1,  TILE_O)     f32   b_fc tile
    pred_ref,     # (B, TILE_O)      f32   prediction tile (out)
    hout_ref,     # (B, Hd)          f32   new hidden (out, aliased to h)
    cout_ref,     # (B, Hd)          f32   new cell   (out, aliased to c)
    x_scr,        # (B, E+He+Hd)     bf16  VMEM scratch: [emb, ctx, h_new]
):
    # ---- LSTM cell: compute once (first vocab tile), keep FC input in scratch --
    @pl.when(pl.program_id(0) == 0)
    def _():
        emb = emb_ref[...]
        ctx = ctx_ref[...]
        h = h_ref[...]
        c = c_ref[...]
        Hd = h.shape[1]

        # gates = cat(emb, ctx) @ W_ih^T + h @ W_hh^T + b, with the concat split
        # into partial matmuls (no VMEM concat for the gate computation).
        gates = (
            jnp.dot(emb, wih_e_ref[...], preferred_element_type=jnp.float32)
            + jnp.dot(ctx, wih_c_ref[...], preferred_element_type=jnp.float32)
            + jnp.dot(h.astype(whh_ref.dtype), whh_ref[...],
                      preferred_element_type=jnp.float32)
            + b_ref[...]
        )

        # PyTorch gate ordering: i, f, g, o  (elementwise math stays f32)
        i_g = jax.nn.sigmoid(gates[:, 0 * Hd:1 * Hd])
        f_g = jax.nn.sigmoid(gates[:, 1 * Hd:2 * Hd])
        g_g = jnp.tanh(gates[:, 2 * Hd:3 * Hd])
        o_g = jax.nn.sigmoid(gates[:, 3 * Hd:4 * Hd])

        c_new = f_g * c + i_g * g_g
        h_new = o_g * jnp.tanh(c_new)

        hout_ref[...] = h_new.astype(hout_ref.dtype)
        cout_ref[...] = c_new.astype(cout_ref.dtype)

        # FC input, built once and reused for every vocab tile.
        x_cat = jnp.concatenate(
            [emb.astype(jnp.float32), ctx.astype(jnp.float32), h_new], axis=1)
        x_scr[...] = x_cat.astype(x_scr.dtype)

    # ---- FC head for this vocab tile: one fused matmul over [emb, ctx, h_new] --
    pred = (
        jnp.dot(x_scr[...], wfc_ref[...], preferred_element_type=jnp.float32)
        + bfc_ref[...]
    )
    pred_ref[...] = pred.astype(pred_ref.dtype)


# -----------------------------------------------------------------------------
# Parameters
# -----------------------------------------------------------------------------
def _fc_tile(output_dim):
    # 128-wide tiles keep the demo grid non-trivial and match v5e's MXU width;
    # 256 feeds the v6e/v7x 256-wide MXU better once the vocab is large.
    return 128 if output_dim <= 2048 else 256


def init_decoder_params(key, output_dim, emb_dim, enc_hid_dim, dec_hid_dim):
    """Raw parameters in PyTorch layout (used by the pure-JAX reference)."""
    ks = jax.random.split(key, 7)
    scale = 0.1
    return {
        "embedding": scale * jax.random.normal(ks[0], (output_dim, emb_dim), jnp.float32),
        # nn.LSTM(input=emb+enc_hid, hidden=dec_hid)
        "w_ih": scale * jax.random.normal(ks[1], (4 * dec_hid_dim, emb_dim + enc_hid_dim), jnp.float32),
        "w_hh": scale * jax.random.normal(ks[2], (4 * dec_hid_dim, dec_hid_dim), jnp.float32),
        "b_ih": scale * jax.random.normal(ks[3], (4 * dec_hid_dim,), jnp.float32),
        "b_hh": scale * jax.random.normal(ks[4], (4 * dec_hid_dim,), jnp.float32),
        # nn.Linear(emb+enc_hid+dec_hid, output_dim)
        "w_fc": scale * jax.random.normal(ks[5], (output_dim, emb_dim + enc_hid_dim + dec_hid_dim), jnp.float32),
        "b_fc": scale * jax.random.normal(ks[6], (output_dim,), jnp.float32),
    }


def prepare_decoder_params(raw, compute_dtype=jnp.bfloat16):
    """One-time conversion to kernel layout: transpose, split at concat
    boundaries (LSTM input), fold LSTM biases, pad vocab to the FC tile,
    cast matmul operands to bf16."""
    output_dim, emb_dim = raw["embedding"].shape
    enc_hid_dim = raw["w_ih"].shape[1] - emb_dim
    E = emb_dim

    tile_o = _fc_tile(output_dim)
    o_pad = ((output_dim + tile_o - 1) // tile_o) * tile_o

    w_ih_t = raw["w_ih"].T                    # (E+He, 4*Hd)
    w_fc_t = raw["w_fc"].T                    # (E+He+Hd, O)
    b_fc = raw["b_fc"]
    if o_pad != output_dim:
        w_fc_t = jnp.pad(w_fc_t, ((0, 0), (0, o_pad - output_dim)))
        b_fc = jnp.pad(b_fc, (0, o_pad - output_dim))

    return {
        "embedding": raw["embedding"],                                 # (O, E) f32 gather table
        "w_ih_e": w_ih_t[:E].astype(compute_dtype),                    # (E,  4*Hd)
        "w_ih_c": w_ih_t[E:].astype(compute_dtype),                    # (He, 4*Hd)
        "w_hh_t": raw["w_hh"].T.astype(compute_dtype),                 # (Hd, 4*Hd)
        "b_lstm": (raw["b_ih"] + raw["b_hh"])[None, :].astype(jnp.float32),
        "w_fc_t": w_fc_t.astype(compute_dtype),                        # (E+He+Hd, O_pad)
        "b_fc": b_fc[None, :].astype(jnp.float32),                     # (1,  O_pad)
    }


# -----------------------------------------------------------------------------
# Forward
# -----------------------------------------------------------------------------
def decoder_forward(kp, tok, hidden, cell, context):
    """tok: (B,) int32; hidden/cell: (B, Hd) f32; context: (B, He) f32."""
    B = tok.shape[0]
    output_dim, emb_dim = kp["embedding"].shape
    enc_hid_dim = context.shape[1]
    dec_hid_dim = hidden.shape[1]
    in_fc = emb_dim + enc_hid_dim + dec_hid_dim
    o_pad = kp["w_fc_t"].shape[1]
    tile_o = _fc_tile(output_dim)
    n_tiles = o_pad // tile_o
    cdt = kp["w_fc_t"].dtype

    # glue: embedding gather + dropout (identity at inference)
    # TODO(synk): training-mode dropout (Bernoulli mask) not implemented; eval semantics used.
    embedded = jnp.take(kp["embedding"], tok, axis=0).astype(cdt)   # (B, E)
    ctx = context.astype(cdt)                                       # (B, He)

    const = lambda j: (0, 0)   # resident across all vocab tiles
    tile = lambda j: (0, j)    # streamed (double-buffered) per vocab tile

    grid_spec = pltpu.PrefetchScalarGridSpec(
        num_scalar_prefetch=0,
        grid=(n_tiles,),
        in_specs=[
            pl.BlockSpec((B, emb_dim), const),                   # embedded
            pl.BlockSpec((B, enc_hid_dim), const),               # context
            pl.BlockSpec((B, dec_hid_dim), const),               # hidden
            pl.BlockSpec((B, dec_hid_dim), const),               # cell
            pl.BlockSpec((emb_dim, 4 * dec_hid_dim), const),     # w_ih_e
            pl.BlockSpec((enc_hid_dim, 4 * dec_hid_dim), const), # w_ih_c
            pl.BlockSpec((dec_hid_dim, 4 * dec_hid_dim), const), # w_hh_t
            pl.BlockSpec((1, 4 * dec_hid_dim), const),           # b_lstm
            pl.BlockSpec((in_fc, tile_o), tile),                 # w_fc_t (streamed)
            pl.BlockSpec((1, tile_o), tile),                     # b_fc   (streamed)
        ],
        out_specs=(
            pl.BlockSpec((B, tile_o), tile),                     # pred
            pl.BlockSpec((B, dec_hid_dim), const),               # hidden_new
            pl.BlockSpec((B, dec_hid_dim), const),               # cell_new
        ),
        scratch_shapes=[pltpu.VMEM((B, in_fc), cdt)],            # [emb, ctx, h_new]
    )

    pred, h_new, c_new = pl.pallas_call(
        _decoder_step_kernel,
        out_shape=(
            jax.ShapeDtypeStruct((B, o_pad), jnp.float32),
            jax.ShapeDtypeStruct((B, dec_hid_dim), jnp.float32),
            jax.ShapeDtypeStruct((B, dec_hid_dim), jnp.float32),
        ),
        grid_spec=grid_spec,
        # hidden -> hidden_new, cell -> cell_new updated in place when donated.
        input_output_aliases={2: 1, 3: 2},
        compiler_params=pltpu.CompilerParams(
            # LSTM state / FC input is computed once (tile 0) and reused from
            # VMEM scratch, so the vocab-tile axis must stay sequential.
            dimension_semantics=("arbitrary",),
        ),
    )(embedded, ctx, hidden, cell,
      kp["w_ih_e"], kp["w_ih_c"], kp["w_hh_t"], kp["b_lstm"],
      kp["w_fc_t"], kp["b_fc"])

    if o_pad != output_dim:
        pred = pred[:, :output_dim]
    return pred, (h_new, c_new)


# -----------------------------------------------------------------------------
# Pure-JAX reference (mirrors the PyTorch forward, f32 end to end)
# -----------------------------------------------------------------------------
def decoder_forward_ref(raw, tok, hidden, cell, context):
    embedded = jnp.take(raw["embedding"], tok, axis=0)
    x = jnp.concatenate([embedded, context], axis=1)
    gates = x @ raw["w_ih"].T + hidden @ raw["w_hh"].T + raw["b_ih"] + raw["b_hh"]
    Hd = hidden.shape[1]
    i = jax.nn.sigmoid(gates[:, 0 * Hd:1 * Hd])
    f = jax.nn.sigmoid(gates[:, 1 * Hd:2 * Hd])
    g = jnp.tanh(gates[:, 2 * Hd:3 * Hd])
    o = jax.nn.sigmoid(gates[:, 3 * Hd:4 * Hd])
    c_new = f * cell + i * g
    h_new = o * jnp.tanh(c_new)
    pred = jnp.concatenate([embedded, context, h_new], axis=1) @ raw["w_fc"].T + raw["b_fc"]
    return pred, (h_new, c_new)


if __name__ == "__main__":
    # Small, module-consistent shapes (vocab chosen so the FC grid has 2 tiles).
    B = 8
    OUTPUT_DIM = 256
    EMB_DIM = 32
    ENC_HID_DIM = 32
    DEC_HID_DIM = 32

    key = jax.random.PRNGKey(0)
    kparam, k1, k2, k3, k4 = jax.random.split(key, 5)

    raw = init_decoder_params(kparam, OUTPUT_DIM, EMB_DIM, ENC_HID_DIM, DEC_HID_DIM)
    kernel_params = prepare_decoder_params(raw)   # one-time transpose/split/fold/cast

    tok = jax.random.randint(k1, (B,), 0, OUTPUT_DIM, dtype=jnp.int32)
    hidden = jax.random.normal(k2, (B, DEC_HID_DIM), jnp.float32)
    cell = jax.random.normal(k3, (B, DEC_HID_DIM), jnp.float32)
    context = jax.random.normal(k4, (B, ENC_HID_DIM), jnp.float32)

    # Reference first (kernel inputs hidden/cell may be aliased/donated).
    pred_r, (h_r, c_r) = decoder_forward_ref(raw, tok, hidden, cell, context)
    pred_r, h_r, c_r = jax.device_get((pred_r, h_r, c_r))

    fwd = jax.jit(decoder_forward)
    pred, (h_new, c_new) = fwd(kernel_params, tok, hidden, cell, context)
    jax.block_until_ready((pred, h_new, c_new))

    # bf16 matmuls -> looser tolerance than the pure-f32 reference.
    assert jnp.allclose(pred, pred_r, atol=5e-2, rtol=5e-2)
    assert jnp.allclose(h_new, h_r, atol=2e-2, rtol=2e-2)
    assert jnp.allclose(c_new, c_r, atol=2e-2, rtol=2e-2)

    print("KERNEL_OK")
</pallas_src>

<mosaic_0001>
module attributes {stable_mosaic.version = 11 : i64} {
  func.func @_decoder_step_kernel(%arg0: i32, %arg1: memref<8x32xbf16, #tpu.memory_space<vmem>>, %arg2: memref<8x32xbf16, #tpu.memory_space<vmem>>, %arg3: memref<8x32xf32, #tpu.memory_space<vmem>>, %arg4: memref<8x32xf32, #tpu.memory_space<vmem>>, %arg5: memref<32x128xbf16, #tpu.memory_space<vmem>>, %arg6: memref<32x128xbf16, #tpu.memory_space<vmem>>, %arg7: memref<32x128xbf16, #tpu.memory_space<vmem>>, %arg8: memref<1x128xf32, #tpu.memory_space<vmem>>, %arg9: memref<96x128xbf16, #tpu.memory_space<vmem>>, %arg10: memref<1x128xf32, #tpu.memory_space<vmem>>, %arg11: memref<8x128xf32, #tpu.memory_space<vmem>>, %arg12: memref<8x32xf32, #tpu.memory_space<vmem>>, %arg13: memref<8x32xf32, #tpu.memory_space<vmem>>, %arg14: memref<8x96xbf16, #tpu.memory_space<vmem>>) attributes {dimension_semantics = [#tpu.dimension_semantics<arbitrary>], iteration_bounds = array<i64: 2>, scalar_prefetch = 0 : i64, scratch_operands = 1 : i64, tpu.core_type = #tpu.core_type<tc>, window_params = [{pipeline_mode = #tpu.pipeline_mode<synchronous>, transform_indices = @transform_0, window_bounds = array<i64: 8, 32>}, {pipeline_mode = #tpu.pipeline_mode<synchronous>, transform_indices = @transform_1, window_bounds = array<i64: 8, 32>}, {pipeline_mode = #tpu.pipeline_mode<synchronous>, transform_indices = @transform_2, window_bounds = array<i64: 8, 32>}, {pipeline_mode = #tpu.pipeline_mode<synchronous>, transform_indices = @transform_3, window_bounds = array<i64: 8, 32>}, {pipeline_mode = #tpu.pipeline_mode<synchronous>, transform_indices = @transform_4, window_bounds = array<i64: 32, 128>}, {pipeline_mode = #tpu.pipeline_mode<synchronous>, transform_indices = @transform_5, window_bounds = array<i64: 32, 128>}, {pipeline_mode = #tpu.pipeline_mode<synchronous>, transform_indices = @transform_6, window_bounds = array<i64: 32, 128>}, {pipeline_mode = #tpu.pipeline_mode<synchronous>, transform_indices = @transform_7, window_bounds = array<i64: 1, 128>}, {transform_indices = @transform_8, window_bounds = array<i64: 96, 128>}, {transform_indices = @transform_9, window_bounds = array<i64: 1, 128>}, {transform_indices = @transform_10, window_bounds = array<i64: 8, 128>}, {pipeline_mode = #tpu.pipeline_mode<synchronous>, transform_indices = @transform_11, window_bounds = array<i64: 8, 32>}, {pipeline_mode = #tpu.pipeline_mode<synchronous>, transform_indices = @transform_12, window_bounds = array<i64: 8, 32>}]} {
    %c0_i32 = arith.constant 0 : i32
    %0 = arith.cmpi eq, %arg0, %c0_i32 : i32
    %1 = arith.extui %0 : i1 to i32
    %c0_i32_0 = arith.constant 0 : i32
    %2 = arith.cmpi ne, %1, %c0_i32_0 : i32
    scf.if %2 {
      %c0_8 = arith.constant 0 : index
      %c0_9 = arith.constant 0 : index
      %10 = vector.load %arg1[%c0_8, %c0_9] : memref<8x32xbf16, #tpu.memory_space<vmem>>, vector<8x32xbf16>
      %c0_10 = arith.constant 0 : index
      %c0_11 = arith.constant 0 : index
      %11 = vector.load %arg2[%c0_10, %c0_11] : memref<8x32xbf16, #tpu.memory_space<vmem>>, vector<8x32xbf16>
      %c0_12 = arith.constant 0 : index
      %c0_13 = arith.constant 0 : index
      %12 = vector.load %arg3[%c0_12, %c0_13] : memref<8x32xf32, #tpu.memory_space<vmem>>, vector<8x32xf32>
      %c0_14 = arith.constant 0 : index
      %c0_15 = arith.constant 0 : index
      %13 = vector.load %arg4[%c0_14, %c0_15] : memref<8x32xf32, #tpu.memory_space<vmem>>, vector<8x32xf32>
      %c0_16 = arith.constant 0 : index
      %c0_17 = arith.constant 0 : index
      %14 = vector.load %arg5[%c0_16, %c0_17] : memref<32x128xbf16, #tpu.memory_space<vmem>>, vector<32x128xbf16>
      %cst_18 = arith.constant dense<0.000000e+00> : vector<8x128xf32>
      %15 = tpu.matmul %10, %14, %cst_18 {dimension_numbers = #tpu.dot_dimension_numbers<[1], [0], [0], [1], [0, 0, 1, 1], [], []>} : vector<8x32xbf16>, vector<32x128xbf16>, vector<8x128xf32> -> vector<8x128xf32>
      %c0_19 = arith.constant 0 : index
      %c0_20 = arith.constant 0 : index
      %16 = vector.load %arg6[%c0_19, %c0_20] : memref<32x128xbf16, #tpu.memory_space<vmem>>, vector<32x128xbf16>
      %cst_21 = arith.constant dense<0.000000e+00> : vector<8x128xf32>
      %17 = tpu.matmul %11, %16, %cst_21 {dimension_numbers = #tpu.dot_dimension_numbers<[1], [0], [0], [1], [0, 0, 1, 1], [], []>} : vector<8x32xbf16>, vector<32x128xbf16>, vector<8x128xf32> -> vector<8x128xf32>
      %18 = arith.addf %15, %17 : vector<8x128xf32>
      %19 = arith.truncf %12 : vector<8x32xf32> to vector<8x32xbf16>
      %c0_22 = arith.constant 0 : index
      %c0_23 = arith.constant 0 : index
      %20 = vector.load %arg7[%c0_22, %c0_23] : memref<32x128xbf16, #tpu.memory_space<vmem>>, vector<32x128xbf16>
      %cst_24 = arith.constant dense<0.000000e+00> : vector<8x128xf32>
      %21 = tpu.matmul %19, %20, %cst_24 {dimension_numbers = #tpu.dot_dimension_numbers<[1], [0], [0], [1], [0, 0, 1, 1], [], []>} : vector<8x32xbf16>, vector<32x128xbf16>, vector<8x128xf32> -> vector<8x128xf32>
      %22 = arith.addf %18, %21 : vector<8x128xf32>
      %c0_25 = arith.constant 0 : index
      %c0_26 = arith.constant 0 : index
      %23 = vector.load %arg8[%c0_25, %c0_26] : memref<1x128xf32, #tpu.memory_space<vmem>>, vector<1x128xf32>
      %24 = vector.broadcast %23 : vector<1x128xf32> to vector<8x128xf32>
      %25 = arith.addf %22, %24 : vector<8x128xf32>
      %26 = vector.extract_strided_slice %25 {offsets = [0, 0], sizes = [8, 32], strides = [1, 1]} : vector<8x128xf32> to vector<8x32xf32>
      %27 = arith.negf %26 : vector<8x32xf32>
      %28 = math.exp %27 : vector<8x32xf32>
      %cst_27 = arith.constant 1.000000e+00 : f32
      %29 = vector.broadcast %cst_27 : f32 to vector<8x32xf32>
      %30 = arith.addf %29, %28 : vector<8x32xf32>
      %31 = arith.divf %29, %30 : vector<8x32xf32>
      %32 = vector.extract_strided_slice %25 {offsets = [0, 32], sizes = [8, 32], strides = [1, 1]} : vector<8x128xf32> to vector<8x32xf32>
      %33 = arith.negf %32 : vector<8x32xf32>
      %34 = math.exp %33 : vector<8x32xf32>
      %cst_28 = arith.constant 1.000000e+00 : f32
      %35 = vector.broadcast %cst_28 : f32 to vector<8x32xf32>
      %36 = arith.addf %35, %34 : vector<8x32xf32>
      %37 = arith.divf %35, %36 : vector<8x32xf32>
      %38 = vector.extract_strided_slice %25 {offsets = [0, 64], sizes = [8, 32], strides = [1, 1]} : vector<8x128xf32> to vector<8x32xf32>
      %39 = math.tanh %38 : vector<8x32xf32>
      %40 = vector.extract_strided_slice %25 {offsets = [0, 96], sizes = [8, 32], strides = [1, 1]} : vector<8x128xf32> to vector<8x32xf32>
      %41 = arith.negf %40 : vector<8x32xf32>
      %42 = math.exp %41 : vector<8x32xf32>
      %cst_29 = arith.constant 1.000000e+00 : f32
      %43 = vector.broadcast %cst_29 : f32 to vector<8x32xf32>
      %44 = arith.addf %43, %42 : vector<8x32xf32>
      %45 = arith.divf %43, %44 : vector<8x32xf32>
      %46 = arith.mulf %37, %13 : vector<8x32xf32>
      %47 = arith.mulf %31, %39 : vector<8x32xf32>
      %48 = arith.addf %46, %47 : vector<8x32xf32>
      %49 = math.tanh %48 : vector<8x32xf32>
      %50 = arith.mulf %45, %49 : vector<8x32xf32>
      %c0_30 = arith.constant 0 : index
      %c0_31 = arith.constant 0 : index
      %51 = vector.load %arg12[%c0_30, %c0_31] : memref<8x32xf32, #tpu.memory_space<vmem>>, vector<8x32xf32>
      tpu.vector_store %arg12[%c0_30, %c0_31], %50 {strides = array<i32>} : memref<8x32xf32, #tpu.memory_space<vmem>>, vector<8x32xf32>,
      %c0_32 = arith.constant 0 : index
      %c0_33 = arith.constant 0 : index
      %52 = vector.load %arg13[%c0_32, %c0_33] : memref<8x32xf32, #tpu.memory_space<vmem>>, vector<8x32xf32>
      tpu.vector_store %arg13[%c0_32, %c0_33], %48 {strides = array<i32>} : memref<8x32xf32, #tpu.memory_space<vmem>>, vector<8x32xf32>,
      %53 = arith.extf %10 : vector<8x32xbf16> to vector<8x32xf32>
      %54 = arith.extf %11 : vector<8x32xbf16> to vector<8x32xf32>
      %55 = tpu.concatenate %53, %54, %50 in 1 : vector<8x32xf32>, vector<8x32xf32>, vector<8x32xf32> -> vector<8x96xf32>
      %56 = arith.truncf %55 : vector<8x96xf32> to vector<8x96xbf16>
      %c0_34 = arith.constant 0 : index
      %c0_35 = arith.constant 0 : index
      %57 = vector.load %arg14[%c0_34, %c0_35] : memref<8x96xbf16, #tpu.memory_space<vmem>>, vector<8x96xbf16>
      tpu.vector_store %arg14[%c0_34, %c0_35], %56 {strides = array<i32>} : memref<8x96xbf16, #tpu.memory_space<vmem>>, vector<8x96xbf16>,
    } else {
    }
    %c0 = arith.constant 0 : index
    %c0_1 = arith.constant 0 : index
    %3 = vector.load %arg14[%c0, %c0_1] : memref<8x96xbf16, #tpu.memory_space<vmem>>, vector<8x96xbf16>
    %c0_2 = arith.constant 0 : index
    %c0_3 = arith.constant 0 : index
    %4 = vector.load %arg9[%c0_2, %c0_3] : memref<96x128xbf16, #tpu.memory_space<vmem>>, vector<96x128xbf16>
    %cst = arith.constant dense<0.000000e+00> : vector<8x128xf32>
    %5 = tpu.matmul %3, %4, %cst {dimension_numbers = #tpu.dot_dimension_numbers<[1], [0], [0], [1], [0, 0, 1, 1], [], []>} : vector<8x96xbf16>, vector<96x128xbf16>, vector<8x128xf32> -> vector<8x128xf32>
    %c0_4 = arith.constant 0 : index
    %c0_5 = arith.constant 0 : index
    %6 = vector.load %arg10[%c0_4, %c0_5] : memref<1x128xf32, #tpu.memory_space<vmem>>, vector<1x128xf32>
    %7 = vector.broadcast %6 : vector<1x128xf32> to vector<8x128xf32>
    %8 = arith.addf %5, %7 : vector<8x128xf32>
    %c0_6 = arith.constant 0 : index
    %c0_7 = arith.constant 0 : index
    %9 = vector.load %arg11[%c0_6, %c0_7] : memref<8x128xf32, #tpu.memory_space<vmem>>, vector<8x128xf32>
    tpu.vector_store %arg11[%c0_6, %c0_7], %8 {strides = array<i32>} : memref<8x128xf32, #tpu.memory_space<vmem>>, vector<8x128xf32>,
    return
  }
  func.func @transform_0(%arg0: i32) -> (i32, i32) {
    %c0_i32 = arith.constant 0 : i32
    %c0_i32_0 = arith.constant 0 : i32
    %c0_i32_1 = arith.constant 0 : i32
    return %c0_i32, %c0_i32_0 : i32, i32
  }
  func.func @transform_1(%arg0: i32) -> (i32, i32) {
    %c0_i32 = arith.constant 0 : i32
    %c0_i32_0 = arith.constant 0 : i32
    %c0_i32_1 = arith.constant 0 : i32
    return %c0_i32, %c0_i32_0 : i32, i32
  }
  func.func @transform_2(%arg0: i32) -> (i32, i32) {
    %c0_i32 = arith.constant 0 : i32
    %c0_i32_0 = arith.constant 0 : i32
    %c0_i32_1 = arith.constant 0 : i32
    return %c0_i32, %c0_i32_0 : i32, i32
  }
  func.func @transform_3(%arg0: i32) -> (i32, i32) {
    %c0_i32 = arith.constant 0 : i32
    %c0_i32_0 = arith.constant 0 : i32
    %c0_i32_1 = arith.constant 0 : i32
    return %c0_i32, %c0_i32_0 : i32, i32
  }
  func.func @transform_4(%arg0: i32) -> (i32, i32) {
    %c0_i32 = arith.constant 0 : i32
    %c0_i32_0 = arith.constant 0 : i32
    %c0_i32_1 = arith.constant 0 : i32
    return %c0_i32, %c0_i32_0 : i32, i32
  }
  func.func @transform_5(%arg0: i32) -> (i32, i32) {
    %c0_i32 = arith.constant 0 : i32
    %c0_i32_0 = arith.constant 0 : i32
    %c0_i32_1 = arith.constant 0 : i32
    return %c0_i32, %c0_i32_0 : i32, i32
  }
  func.func @transform_6(%arg0: i32) -> (i32, i32) {
    %c0_i32 = arith.constant 0 : i32
    %c0_i32_0 = arith.constant 0 : i32
    %c0_i32_1 = arith.constant 0 : i32
    return %c0_i32, %c0_i32_0 : i32, i32
  }
  func.func @transform_7(%arg0: i32) -> (i32, i32) {
    %c0_i32 = arith.constant 0 : i32
    %c0_i32_0 = arith.constant 0 : i32
    %c0_i32_1 = arith.constant 0 : i32
    return %c0_i32, %c0_i32_0 : i32, i32
  }
  func.func @transform_8(%arg0: i32) -> (i32, i32) {
    %c0_i32 = arith.constant 0 : i32
    %c0_i32_0 = arith.constant 0 : i32
    return %c0_i32, %arg0 : i32, i32
  }
  func.func @transform_9(%arg0: i32) -> (i32, i32) {
    %c0_i32 = arith.constant 0 : i32
    %c0_i32_0 = arith.constant 0 : i32
    return %c0_i32, %arg0 : i32, i32
  }
  func.func @transform_10(%arg0: i32) -> (i32, i32) {
    %c0_i32 = arith.constant 0 : i32
    %c0_i32_0 = arith.constant 0 : i32
    return %c0_i32, %arg0 : i32, i32
  }
  func.func @transform_11(%arg0: i32) -> (i32, i32) {
    %c0_i32 = arith.constant 0 : i32
    %c0_i32_0 = arith.constant 0 : i32
    %c0_i32_1 = arith.constant 0 : i32
    return %c0_i32, %c0_i32_0 : i32, i32
  }
  func.func @transform_12(%arg0: i32) -> (i32, i32) {
    %c0_i32 = arith.constant 0 : i32
    %c0_i32_0 = arith.constant 0 : i32
    %c0_i32_1 = arith.constant 0 : i32
    return %c0_i32, %c0_i32_0 : i32, i32
  }
}

</mosaic_0001>

<bundles_post_ra>
// kernel: decoder_forward.1
= control target key start
LH: loop header
LB: loop body
LE: loop exit
PB: predicated region body
PF: predicated region fallthrough
CT: control target
= control target key end

     0   :  { %s1789_s0 = inlined_call_operand.vmem [shape: bf16[8,32], index: 0, kind: input, shape index: {}]   ;;  %s1790_s1 = inlined_call_operand.vmem [shape: bf16[8,32], index: 1, kind: input, shape index: {}]   ;;  %s1791_s2 = inlined_call_operand.hbm [shape: f32[8,32], index: 2, kind: input, shape index: {}, may-alias: {2,11}]   ;;  %s1792_s3 = inlined_call_operand.hbm [shape: f32[8,32], index: 3, kind: input, shape index: {}, may-alias: {3,12}]   ;;  %s1793_s4 = inlined_call_operand.vmem [shape: bf16[32,128], index: 4, kind: input, shape index: {}]   ;;  %s1794_s5 = inlined_call_operand.vmem [shape: bf16[32,128], index: 5, kind: input, shape index: {}]   ;;  %s1795_s6 = inlined_call_operand.vmem [shape: bf16[32,128], index: 6, kind: input, shape index: {}]   ;;  %s1796_s7 = inlined_call_operand.vmem [shape: f32[1,128], index: 7, kind: input, shape index: {}]   ;;  %s1797_s8 = inlined_call_operand.vmem [shape: bf16[96,256], index: 8, kind: input, shape index: {}]   ;;  %s1798_s9 = inlined_call_operand.vmem [shape: f32[1,256], index: 9, kind: input, shape index: {}]   ;;  %s1799_s10 = inlined_call_operand.hbm [shape: f32[8,256], index: 10, kind: output, shape index: {0}]   ;;  %s1800_s11 = inlined_call_operand.hbm [shape: f32[8,32], index: 11, kind: output, shape index: {1}, may-alias: {2,11}]   ;;  %s1801_s12 = inlined_call_operand.hbm [shape: f32[8,32], index: 12, kind: output, shape index: {2}, may-alias: {3,12}]  }
   0x1   :  { %1811 = sst [smem:[#allocation21_spill]] %s1799_s10 }
   0x2   :  { %18 = vsyncpa [#allocation4], 0 }
   0x3   :  { %19 = vsyncpa [#allocation7], 0 }
   0x4   :  { %20 = vsyncpa [#allocation5], 0 }
   0x5   :  { %22 = vsyncpa [#allocation5 + $0x1], 0 }
   0x6   :  { %23 = vsyncpa [#allocation11], 0  ;;  %s1495_s21 = smov 0   ;;  %s1497_s22 = smov 0  }
   0x7   :  { %s1499_s23 = smov 0   ;;  %s1501_s24 = smov 0  }
   0x8 LB: > { %1812 = sst [smem:[#allocation17_spill]] %s1404_s21  ;;  %s1516_s25 = sadd.s32 4294967295, %s1416_s24   ;;  %s1416_s24 = sphi %s1501_s24, %s1840_s24   ;;  %s1412_s23 = sphi %s1499_s23, %s1844_s23   ;;  %s1408_s22 = sphi %s1497_s22, %s1843_s22   ;;  %s1404_s21 = sphi %s1495_s21, %s1842_s21  }
   0x9   : > { %s1037_s26 = sadd.s32 4294967294, %s1416_s24   ;;  %s1520_s27 = sadd.s32 1, %s1416_s24  }
   0xa   : > { %1813 = sst [smem:[#allocation18_spill]] %s1520_s27  ;;  %s204_s28 = sadd.s32 1, %s1412_s23 }
   0xb   : > { %s201_s29 = ssub.s32 %s1416_s24, %s1520_s27  ;;  %p211_p0 = scmp.ne.s32.totalorder %s1412_s23, %s1408_s22 }
   0xc   : > { %p202_p1 = scmp.eq.s32.totalorder %s201_s29, 0  ;;  %p212_p2 = scmp.eq.s32.totalorder %s1416_s24, 0 }
   0xd   : > { %p1806_p3 = scmp.eq.s32.totalorder %s1516_s25, 1  ;;  %p272_p4 = scmp.ne.s32.totalorder %s1408_s22, %s1404_s21 }
   0xe   : > { %s1532_s30 = scalar_select %p202_p1, %s1412_s23, %s204_s28  }
   0xf   : > { %p1534_p5 = por %p212_p2, %p211_p0  ;;  %p1540_p6 = por %p1806_p3, %p211_p0 }
  0x10   : > { %1814 = sst [smem:[#allocation19_spill]] %s1532_s30  ;;  %p273_p7 = scmp.eq.s32.totalorder %s1037_s26, 1 }
  0x11   : > { %s1815_s13 = scalar_select %p1534_p5, 1, 0 }
  0x12   : > { %s1816_s14 = scalar_select %p1540_p6, 1, 0 }
  0x13   : > { %p1038_p8 = scmp.ge.s32.totalorder %s1416_s24, 1  ;;  %p322_p9 = scmp.lt.s32.totalorder %s1416_s24, 3 }
  0x14   : > { %p1547_p11 = por %p273_p7, %p272_p4  ;;  %p1807_p12 = scmp.eq.s32.totalorder %s1516_s25, 0 }
  0x15   : > { %p1552_p13 = pnand %p1038_p8, %p322_p9  ;;  %s1418_s17 = smov [#allocation3]  }
  0x16   : > { %s1817_s15 = scalar_select %p1547_p11, 1, 0 }
  0x17   : > { %s1819_s16 = scalar_select %p1552_p13, 1, 0 }
  0x18   : > { %1818 = sst [smem:[#allocation20_spill]] %s1817_s15  ;;  %s341_s18 = sshll.u32 %s1418_s17, 4  ;;  %s342_s18 = int_to_ptr.vmem [resolvable:$true] %s341_s18 }
  0x19   : > { %p1151_p0 = pneg %p1552_p13  ;;  %s1419_s19 = smov [#allocation6]  }
  0x1a   : > { %s352_s20 = sshll.u32 %s1419_s19, 4  ;;  %s1234_s30 = scalar_lea.hbm %s1791_s2, 128  ;;  %s1564_s20 = int_to_ptr.vmem [resolvable:$true] %s352_s20 }
  0x1b   : > { %p1560_p1 = pnand %p1807_p12, %p1151_p0  ;;  %p1235_p2 = scmp.ne.s32.totalorder %s1791_s2, %s1234_s30 }
  0x1c   : > { %p1241_p9 = scmp.lt.u32.totalorder %s1234_s30, %s1791_s2 }
  0x1d   : > { %p1236_p4 = pneg %p1560_p1 }
  0x1f   : > { %p1237_p7 = pnand %p1236_p4, %p1235_p2 }
  0x21   : > { %p1238_p8 = pneg %p1237_p7 }
  0x23   : > { %p1243_p0 = pnand %p1241_p9, %p1238_p8 }
  0x25   : > { %1246 = shalt.err (!%p1243_p0)
}
  0x26   : > { %s1247_s21 = scalar_lea.vmem %s342_s18, 128  ;;  %p1255_p11 = scmp.lt.s32.totalorder %s342_s18, %s342_s18 }
  0x27   : > { %p1248_p3 = scmp.ne.s32.totalorder %s342_s18, %s1247_s21  ;;  %p1256_p6 = scmp.lt.s32.totalorder %s1247_s21, %s1247_s21 }
  0x29   : > { %p1250_p10 = pnand %p1248_p3, %p1236_p4  ;;  %p1257_p13 = por %p1256_p6, %p1255_p11 }
  0x2b   : > { %p1251_p12 = pneg %p1250_p10 }
  0x2d   : > { %p1258_p5 = pnand %p1257_p13, %p1251_p12 }
  0x2f   : > { %1261 = shalt.err (!%p1258_p5)
}
  0x30   : > { %1154 = dma.hbm_to_vmem [thread:$0]  (!%p1560_p1), %s1791_s2, 128, %s342_s18, [#allocation4]  }
  0x31   : > { %s1262_s29 = scalar_lea.hbm %s1792_s3, 128 }
  0x32   : > { %p1263_p3 = scmp.ne.s32.totalorder %s1792_s3, %s1262_s29  ;;  %p1269_p5 = scmp.lt.u32.totalorder %s1262_s29, %s1792_s3 }
  0x34   : > { %p1265_p6 = pnand %p1263_p3, %p1236_p4 }
  0x36   : > { %p1266_p10 = pneg %p1265_p6 }
  0x38   : > { %p1271_p11 = pnand %p1269_p5, %p1266_p10 }
  0x3a   : > { %1274 = shalt.err (!%p1271_p11)
}
  0x3b   : > { %s1275_s18 = scalar_lea.vmem %s1564_s20, 128  ;;  %p1283_p7 = scmp.lt.s32.totalorder %s1564_s20, %s1564_s20 }
  0x3c   : > { %p1276_p12 = scmp.ne.s32.totalorder %s1564_s20, %s1275_s18  ;;  %p1284_p8 = scmp.lt.s32.totalorder %s1275_s18, %s1275_s18 }
  0x3e   : > { %p1278_p13 = pnand %p1276_p12, %p1236_p4  ;;  %p1285_p9 = por %p1284_p8, %p1283_p7 }
  0x40   : > { %p1279_p2 = pneg %p1278_p13 }
  0x42   : > { %p1286_p0 = pnand %p1285_p9, %p1279_p2 }
  0x44   : > { %1289 = shalt.err (!%p1286_p0)
}
  0x45   : > { %1157 = dma.hbm_to_vmem [thread:$0]  (!%p1560_p1), %s1792_s3, 128, %s1564_s20, [#allocation7]  }
  0x46   : > { %p1041_p3 = scmp.ge.s32.totalorder %s1416_s24, 2 }
  0x47   : > { %p1821_p4 = scmp.ne.s32.totalorder (!%p1041_p3), %s1815_s13, 0 }
  0x48   : > { %371 = sbr.rel (%p1041_p3) target bundleno = 91 (0x5b), region = 48 }
  0x4f   : > { %374 = sbr.rel (!%p1821_p4) target bundleno = 91 (0x5b), region = 52  ;;  %s376_s28 = sand.u32 (%p1821_p4), 1, %s1412_s23  }
  0x50   : > { %s1042_s30 = sshll.u32 (%p1821_p4), %s1416_s24, 2  ;;  %s1131_s15 = smul.u32 (%p1821_p4), 48, %s376_s28 }
  0x51   : > { %s380_s17 = scalar_lea.vmem (%p1821_p4), %s1797_s8, %s1042_s30 }
  0x52   : > { %v396_v0 = vld [vmem:[%s380_s17] sm:$0xf] (%p1821_p4)  ;;  %v398_v1 = vld [vmem:[%s380_s17 + $0x8] sm:$0xf] (%p1821_p4)  ;;  %v400_v2 = vld [vmem:[%s380_s17 + $0x10] sm:$0xf] (%p1821_p4) }
  0x53   : > { %v402_v3 = vld [vmem:[%s380_s17 + $0x18] sm:$0xf] (%p1821_p4)  ;;  %v404_v4 = vld [vmem:[%s380_s17 + $0x20] sm:$0xf] (%p1821_p4)  ;;  %s378_s20 = scalar_lea.vmem (%p1821_p4), [#allocation8], %s1131_s15 }
  0x54   : > { %397 = vst [vmem:[%s378_s20] sm:$0xf] (%p1821_p4), %v396_v0  ;;  %399 = vst [vmem:[%s378_s20 + $0x4] sm:$0xf] (%p1821_p4), %v398_v1  ;;  %v406_v5 = vld [vmem:[%s380_s17 + $0x28] sm:$0xf] (%p1821_p4) }
  0x55   : > { %401 = vst [vmem:[%s378_s20 + $0x8] sm:$0xf] (%p1821_p4), %v400_v2  ;;  %403 = vst [vmem:[%s378_s20 + $0xc] sm:$0xf] (%p1821_p4), %v402_v3  ;;  %v408_v6 = vld [vmem:[%s380_s17 + $0x30] sm:$0xf] (%p1821_p4) }
  0x56   : > { %405 = vst [vmem:[%s378_s20 + $0x10] sm:$0xf] %v404_v4  ;;  %v410_v7 = vld [vmem:[%s380_s17 + $0x38] sm:$0xf]  ;;  %407 = vst [vmem:[%s378_s20 + $0x14] sm:$0xf] %v406_v5 }
  0x57   : > { %409 = vst [vmem:[%s378_s20 + $0x18] sm:$0xf] %v408_v6  ;;  %411 = vst [vmem:[%s378_s20 + $0x1c] sm:$0xf] %v410_v7  ;;  %v412_v8 = vld [vmem:[%s380_s17 + $0x40] sm:$0xf] }
  0x58   : > { %v414_v9 = vld [vmem:[%s380_s17 + $0x48] sm:$0xf]  ;;  %v416_v10 = vld [vmem:[%s380_s17 + $0x50] sm:$0xf]  ;;  %413 = vst [vmem:[%s378_s20 + $0x20] sm:$0xf] %v412_v8 }
  0x59   : > { %415 = vst [vmem:[%s378_s20 + $0x24] sm:$0xf] %v414_v9  ;;  %417 = vst [vmem:[%s378_s20 + $0x28] sm:$0xf] %v416_v10  ;;  %v418_v11 = vld [vmem:[%s380_s17 + $0x58] sm:$0xf] }
  0x5a   : > { %419 = vst [vmem:[%s378_s20 + $0x2c] sm:$0xf] %v418_v11 }
  0x5b PF: > { %p1822_p1 = scmp.ne.s32.totalorder %s1819_s16, 0 }
  0x5c   : > { %p1823_p6 = scmp.eq.s32.totalorder (!%p1822_p1), %s1516_s25, 0 }
  0x5d   : > { %475 = sbr.rel (%p1822_p1) target bundleno = 1093 (0x445), region = 97 }
  0x64   : > { %1387 = dma.done.wait (%p1823_p6), [#allocation4], 128   ;;  %p1824_p10 = pmov %p1823_p6 }
  0x65   : > { %p1825_p5 = pmov %p1823_p6 }
  0x66   : > { %1389 = vsyncadd (%p1824_p10), [#allocation4], 4294967168 }
  0x67   : > { %1391 = dma.done.wait (%p1825_p5), [#allocation7], 128   ;;  %p1826_p11 = pmov %p1825_p5 }
  0x68   : > { %s1634_s13 = sand.u32 1, %s1408_s22   ;;  %p530_p12 = scmp.lt.s32.totalorder %s1516_s25, 1 }
  0x69   : > { %1393 = vsyncadd (%p1826_p11), [#allocation7], 4294967168  ;;  %s1132_s16 = smul.u32 48, %s1634_s13  ;;  %s1046_s19 = sshll.u32 %s1634_s13, 3 }
  0x6a   : > { %s1640_s21 = scalar_select %p530_p12, %s1516_s25, 1 }
  0x6b   : > { %s1646_s28 = scalar_lea.vmem [#allocation8], %s1132_s16  ;;  %s1648_s30 = scalar_lea.vmem [#allocation9], %s1046_s19 }
  0x6c   : > { %s532_s27 = scalar_lea.vmem %s1798_s9, %s1640_s21  ;;  %p1827_p13 = scmp.ne.s32.totalorder %s1516_s25, 0 }
  0x6d   : > { %v1214_v12 = vld [vmem:[%s1794_s5] sm:$0xff] (!%p1827_p13)   ;;  %v1420_v13 = vmov (!%p1827_p13), 0.0   ;;  %v1216_v15 = vld [vmem:[%s1794_s5 + $0x8] sm:$0xff] (!%p1827_p13)   ;;  %vm1421_vm0 = vmmov (!%p1827_p13), 0   ;;  %vm562_vm1 = vcmask (!%p1827_p13), 261120   ;;  %s1422_s15 = smov (!%p1827_p13), 64  }
  0x6e   : > { %537 = sbr.rel (%p1827_p13) target bundleno = 835 (0x343), region = 113  ;;  %1091 = vmatprep.subr.bf16.mxu0 (!%p1827_p13), %v1420_v13  ;;  %1099 = vmatprep.subr.bf16.mxu1 (!%p1827_p13), %v1420_v13  ;;  %v1215_v14 = vld [vmem:[%s1793_s4] sm:$0xff] (!%p1827_p13)   ;;  %v1217_v16 = vld [vmem:[%s1793_s4 + $0x8] sm:$0xff] (!%p1827_p13)   ;;  %s1423_s29 = smov (!%p1827_p13), 32   ;;  %vm778_vm2 = vcmask (!%p1827_p13), 523264   ;;  %vm781_vm3 = vcmask (!%p1827_p13), 781312  }
  0x6f   : > { %1092 = vmatpush3.bf16.msra.mxu0 (!%p1827_p13), %v1214_v12  ;;  %1095 = vmatprep.mubr.msk.bf16.mxu0 (!%p1827_p13), %vm1421_vm0, %v1420_v13  ;;  %v539_v17 = vld [vmem:[%s1790_s1] sm:$0xf] (!%p1827_p13)  ;;  %v1219_v20 = vld [vmem:[%s1795_s6 + $0x8] sm:$0xff] (!%p1827_p13)   ;;  %s1424_s26 = smov (!%p1827_p13), 96  }
  0x70   : > { %1100 = vmatpush3.bf16.msra.mxu1 (!%p1827_p13), %v1215_v14  ;;  %1093 = vmatprep.subr.bf16.mxu0 (!%p1827_p13), %v1420_v13  ;;  %v1218_v18 = vld [vmem:[%s1795_s6] sm:$0xff] (!%p1827_p13)   ;;  %v541_v40 = vld [vmem:[#allocation6] sm:$0xff] (!%p1827_p13)  ;;  %v769_v47 = vunpack.c.l.bf16 (!%p1827_p13), %v539_v17 }
  0x71   : > { %1101 = vmatprep.subr.bf16.mxu1 (!%p1827_p13), %v1420_v13  ;;  %1103 = vmatprep.mubr.msk.bf16.mxu1 (!%p1827_p13), %vm1421_vm0, %v1420_v13  ;;  %v538_v19 = vld [vmem:[%s1789_s0] sm:$0xf] (!%p1827_p13)  ;;  %v540_v21 = vld [vmem:[#allocation3] sm:$0xff] (!%p1827_p13) }
  0x72   : > { %v661_v22 = vpack.c.bf16 (!%p1827_p13), %v540_v21, %v540_v21  ;;  %v1057_v33 = vld [vmem:[%s1796_s7] ss:$0 sm:$0xff] (!%p1827_p13)  ;;  %v768_v55 = vunpack.c.l.bf16 (!%p1827_p13), %v538_v19 }
  0x73   : > { %1094 = vmatpush3.bf16.msra.mxu0 (!%p1827_p13), %v1216_v15 }
  0x74   : > { %1102 = vmatpush3.bf16.msra.mxu1 (!%p1827_p13), %v1217_v16  ;;  %1107 = vmatprep.subr.bf16.mxu0 (!%p1827_p13), %v1420_v13 }
  0x76   : > { %1096 = vmatmul.mubr.msk.bf16.vlgmr.msra.gmra.mrb[0].mxu0 %vm562_vm1, %v539_v17 }
  0x77   : > { %1104 = vmatmul.mubr.msk.bf16.vlgmr.msra.gmra.mrb[0].mxu1 %vm562_vm1, %v538_v19  ;;  %1108 = vmatpush3.bf16.msra.mxu0 %v1218_v18 }
  0x78   : > { %1109 = vmatprep.subr.bf16.mxu0 %v1420_v13  ;;  %1111 = vmatprep.mubr.msk.bf16.mxu0 %vm1421_vm0, %v1420_v13 }
  0x7b   : > { %1110 = vmatpush3.bf16.msra.mxu0 %v1219_v20 }
  0x7e   : > { %1112 = vmatmul.mubr.msk.bf16.vlgmr.msra.gmra.mrb[4].mxu0 %vm562_vm1, %v661_v22 }
 0x149   : > { %v600_v23 = vpop.f32.mrb[0].mxu0 }
 0x14a   : > { %v1097_v24 = vpop.f32.mrb[1].mxu0  ;;  %v655_v25 = vpop.f32.mrb[0].mxu1 }
 0x14b   : > { %v656_v26 = vadd.f32 %v655_v25, %v600_v23  ;;  %v603_v27 = vpop.f32.mrb[2].mxu0  ;;  %v1105_v28 = vpop.f32.mrb[1].mxu1 }
 0x14c   : > { %v1098_v29 = vpop.f32.mrb[3].mxu0  ;;  %v658_v30 = vpop.f32.mrb[2].mxu1 }
 0x14d   : > { %v1106_v31 = vpop.f32.mrb[3].mxu1 }
 0x151   : > { %v715_v32 = vpop.f32.mrb[4].mxu0 }
 0x152   : > { %v721_v34 = vadd.f32 %v715_v32, %v656_v26  ;;  %v1113_v35 = vpop.f32.mrb[5].mxu0 }
 0x153   : > { %v718_v36 = vpop.f32.mrb[6].mxu0 }
 0x154   : > { %v729_v37 = vadd.f32 %v1057_v33, %v721_v34  ;;  %v1114_v38 = vpop.f32.mrb[7].mxu0 }
 0x156   : > { %1220 = vtanh.f32 %v729_v37  ;;  %v1058_v41 = vmul.f32 -1.442695, %v729_v37 }
 0x158   : > { %1222 = vpow2.f32 %v1058_v41 }
 0x160   : > { %v1221_v39 = vpop.eup %1220 }
 0x161   : > { %743 = vrot.lane.b32.xlu0 %v1221_v39, %s1422_s15 }
 0x162   : > { %v1223_v42 = vpop.eup %1222 }
 0x163   : > { %v733_v43 = vadd.f32 1.0, %v1223_v42 }
 0x165   : > { %738 = vrot.lane.b32.xlu0 %v541_v40, %s1423_s29  ;;  %1224 = vrcp.f32 %v733_v43 }
 0x169   : > { %771 = vrot.lane.b32.xlu0 %v769_v47, %s1423_s29 }
 0x16f   : > { %v1225_v44 = vpop.eup %1224 }
 0x1d3   : > { %v744_v45 = vpop.permute.xlu0 %743 }
 0x1d4   : > { %v746_v46 = vmul.f32 %v1225_v44, %v744_v45 }
 0x1d6   : > { %748 = vrot.lane.b32.xlu1 %v746_v46, %s1423_s29 }
 0x1d7   : > { %v739_v48 = vpop.permute.xlu0 %738 }
 0x1d8   : > { %v741_v49 = vmul.f32 %v1225_v44, %v739_v48 }
 0x1db   : > { %v772_v56 = vpop.permute.xlu0 %771 }
 0x1dc   : > { %v777_v57 = vsel %vm562_vm1, %v768_v55, %v772_v56 }
 0x248   : > { %v749_v50 = vpop.permute.xlu1 %748 }
 0x249   : > { %v751_v51 = vadd.f32 %v749_v50, %v741_v49 }
 0x24b   : > { %1226 = vtanh.f32 %v751_v51 }
 0x255   : > { %v1227_v52 = vpop.eup %1226 }
 0x256   : > { %754 = vrot.lane.b32.xlu1 %v1227_v52, %s1422_s15 }
 0x2c8   : > { %v755_v53 = vpop.permute.xlu1 %754 }
 0x2c9   : > { %v757_v54 = vmul.f32 %v1225_v44, %v755_v53 }
 0x2cb   : > { %759 = vrot.lane.b32.xlu0 %v757_v54, %s1423_s29  ;;  %774 = vrot.lane.b32.xlu1 %v757_v54, %s1424_s26 }
 0x2cf   : > { %764 = vrot.lane.b32.xlu1 %v751_v51, %s1424_s26 }
 0x33d   : > { %v760_v58 = vpop.permute.xlu0 %759  ;;  %v775_v59 = vpop.permute.xlu1 %774 }
 0x33e   : > { %762 = vst.msk [vmem:[#allocation10] sm:$0xff] %vm562_vm1, %v760_v58  ;;  %v779_v60 = vsel %vm778_vm2, %v777_v57, %v775_v59 }
 0x33f   : > { %v780_v61 = vpack.c.bf16 %v779_v60, %v779_v60 }
 0x341   : > { %782 = vst.msk [vmem:[#allocation2] sm:$0xf] %vm781_vm3, %v780_v61  ;;  %v765_v62 = vpop.permute.xlu1 %764 }
 0x342   : > { %767 = vst.msk [vmem:[#allocation12] sm:$0xff] %vm562_vm1, %v765_v62 }
 0x343 PF: > { %v1228_v63 = vld [vmem:[%s1646_s28] sm:$0xff]   ;;  %v1425_v0 = vmov 0.0   ;;  %v1229_v1 = vld [vmem:[%s1646_s28 + $0x8] sm:$0xff]   ;;  %vm1426_vm4 = vmmov 0   ;;  %v1230_v2 = vld [vmem:[%s1646_s28 + $0x10] sm:$0xff]   ;;  %vm839_vm5 = vcmask 785408  }
 0x344   : > { %1115 = vmatprep.subr.bf16.mxu0 %v1425_v0  ;;  %1127 = vmatprep.mubr.msk.bf16.mxu0 %vm1426_vm4, %v1425_v0  ;;  %v1231_v3 = vld [vmem:[%s1646_s28 + $0x18] sm:$0xff]   ;;  %v1232_v4 = vld [vmem:[%s1646_s28 + $0x20] sm:$0xff]   ;;  %v1233_v5 = vld [vmem:[%s1646_s28 + $0x28] sm:$0xff]   ;;  %s1427_s17 = smov [#allocation10]   ;;  %p1828_p7 = scmp.eq.s32.totalorder %s1516_s25, 1 }
 0x345   : > { %1116 = vmatpush3.bf16.msra.mxu0 %v1228_v63  ;;  %s909_s20 = sshll.u32 %s1427_s17, 4  ;;  %s910_s20 = int_to_ptr.vmem [resolvable:$true] %s909_s20 }
 0x346   : > { %1117 = vmatprep.subr.bf16.mxu0 %v1425_v0  ;;  %s1290_s16 = scalar_lea.vmem %s910_s20, 128  ;;  %p1297_p0 = scmp.lt.s32.totalorder %s910_s20, %s910_s20 }
 0x347   : > { %p1291_p2 = scmp.ne.s32.totalorder %s910_s20, %s1290_s16  ;;  %p1298_p4 = scmp.lt.s32.totalorder %s1290_s16, %s1290_s16 }
 0x348   : > { %v783_v6 = vld [vmem:[#allocation2] sm:$0xf] }
 0x349   : > { %1118 = vmatpush3.bf16.msra.mxu0 %v1229_v1  ;;  %p1292_p8 = pnand %p1291_p2, %p1828_p7  ;;  %p1299_p1 = por %p1298_p4, %p1297_p0 }
 0x34a   : > { %1119 = vmatprep.subr.bf16.mxu0 %v1425_v0 }
 0x34b   : > { %p1293_p9 = pneg %p1292_p8 }
 0x34d   : > { %1120 = vmatpush3.bf16.msra.mxu0 %v1230_v2  ;;  %p1300_p6 = pnand %p1299_p1, %p1293_p9 }
 0x34e   : > { %1121 = vmatprep.subr.bf16.mxu0 %v1425_v0 }
 0x351   : > { %1122 = vmatpush3.bf16.msra.mxu0 %v1231_v3 }
 0x352   : > { %1123 = vmatprep.subr.bf16.mxu0 %v1425_v0 }
 0x355   : > { %1124 = vmatpush3.bf16.msra.mxu0 %v1232_v4 }
 0x356   : > { %1125 = vmatprep.subr.bf16.mxu0 %v1425_v0 }
 0x359   : > { %1126 = vmatpush3.bf16.msra.mxu0 %v1233_v5 }
 0x35c   : > { %1128 = vmatmul.mubr.msk.bf16.vlgmr.msra.gmra.mrb[0].mxu0 %vm839_vm5, %v783_v6 }
 0x35d   : > { %1303 = shalt.err (!%p1300_p6)
}
 0x35e   : > { %s1304_s18 = scalar_lea.hbm %s1800_s11, 128  ;;  %p1829_p5 = pmov %p1828_p7 }
 0x35f   : > { %p1305_p10 = scmp.ne.s32.totalorder %s1800_s11, %s1304_s18  ;;  %p1310_p13 = scmp.lt.u32.totalorder %s1304_s18, %s1800_s11 }
 0x361   : > { %p1306_p11 = pnand %p1305_p10, %p1829_p5 }
 0x363   : > { %p1307_p12 = pneg %p1306_p11 }
 0x365   : > { %p1312_p2 = pnand %p1310_p13, %p1307_p12 }
 0x367   : > { %1315 = shalt.err (!%p1312_p2)
}
 0x368   : > { %p1830_p7 = pmov %p1829_p5  ;;  %s1428_s19 = smov [#allocation12]  }
 0x369   : > { %s920_s28 = sshll.u32 %s1428_s19, 4  ;;  %p1831_p9 = pmov %p1829_p5  ;;  %s921_s28 = int_to_ptr.vmem [resolvable:$true] %s920_s28 }
 0x36a   : > { %1143 = dma.vmem_to_hbm [thread:$0]  (%p1830_p7), %s910_s20, 128, %s1800_s11, [#allocation11]  }
 0x36b   : > { %s1316_s10 = scalar_lea.vmem %s921_s28, 128  ;;  %p1323_p1 = scmp.lt.s32.totalorder %s921_s28, %s921_s28 }
 0x36c   : > { %p1317_p8 = scmp.ne.s32.totalorder %s921_s28, %s1316_s10  ;;  %p1324_p6 = scmp.lt.s32.totalorder %s1316_s10, %s1316_s10 }
 0x36e   : > { %p1318_p0 = pnand %p1317_p8, %p1831_p9  ;;  %p1325_p10 = por %p1324_p6, %p1323_p1 }
 0x370   : > { %p1319_p4 = pneg %p1318_p0 }
 0x372   : > { %p1326_p5 = pnand %p1325_p10, %p1319_p4 }
 0x374   : > { %1329 = shalt.err (!%p1326_p5)
}
 0x375   : > { %s1330_s29 = scalar_lea.hbm %s1801_s12, 128  ;;  %p1832_p12 = pmov %p1830_p7 }
 0x376   : > { %p1331_p11 = scmp.ne.s32.totalorder %s1801_s12, %s1330_s29  ;;  %p1336_p7 = scmp.lt.u32.totalorder %s1330_s29, %s1801_s12 }
 0x378   : > { %p1332_p13 = pnand %p1331_p11, %p1832_p12 }
 0x37a   : > { %p1333_p2 = pneg %p1332_p13 }
 0x37c   : > { %p1338_p8 = pnand %p1336_p7, %p1333_p2 }
 0x37e   : > { %1341 = shalt.err (!%p1338_p8)
}
 0x37f   : > { %1145 = dma.vmem_to_hbm [thread:$0]  (%p1831_p9), %s921_s28, 128, %s1801_s12, [#allocation11]   ;;  %v1059_v7 = vld [vmem:[%s532_s27] ss:$0 sm:$0xff] }
 0x380   : > { %s1068_s29 = sshll.u32 %s1516_s25, 7  ;;  %s898_s26 = sshll.u32 %s1648_s30, 4  ;;  %s1742_s26 = int_to_ptr.vmem [resolvable:$true] %s898_s26 }
 0x381   : > { %s1833_s16 = sld [smem:[#allocation21_spill]]  ;;  %s885_s21 = scalar_lea.sflag [#allocation5], %s1634_s13 }
 0x382   : > { %s1342_s27 = scalar_lea.vmem %s1742_s26, 128  ;;  %p1834_p4 = scmp.ne.s32.totalorder %s1816_s14, 0 }
 0x383   : > { %p1343_p0 = scmp.ne.s32.totalorder %s1742_s26, %s1342_s27  ;;  %s1429_s28 = smov [#allocation9]  }
 0x384   : > { %s1346_s10 = sshll.u32 %s1429_s28, 4  ;;  %s1347_s10 = int_to_ptr.vmem [resolvable:$false] %s1346_s10 }
 0x385   : > { %p1344_p1 = pnand %p1343_p0, %p1834_p4  ;;  %s1348_s18 = scalar_lea.vmem %s1347_s10, 256 }
 0x386   : > { %p1349_p10 = scmp.lt.s32.totalorder %s1742_s26, %s1347_s10  ;;  %p1350_p5 = scmp.lt.s32.totalorder %s1348_s18, %s1342_s27 }
 0x387   : > { %s1740_s19 = scalar_lea.hbm %s1833_s16, %s1068_s29  ;;  %p1345_p6 = pneg %p1344_p1 }
 0x388   : > { %p1351_p11 = por %p1350_p5, %p1349_p10 }
 0x38a   : > { %p1352_p12 = pnand %p1351_p11, %p1345_p6 }
 0x42f   : > { %v877_v8 = vpop.f32.mrb[0].mxu0 }
 0x430   : > { %v878_v9 = vadd.f32 %v1059_v7, %v877_v8  ;;  %v1129_v10 = vpop.f32.mrb[1].mxu0 }
 0x431   : > { %v880_v11 = vpop.f32.mrb[2].mxu0 }
 0x432   : > { %883 = vst [vmem:[%s1648_s30] sm:$0xff] %v878_v9  ;;  %v1130_v12 = vpop.f32.mrb[3].mxu0 }
 0x433   : > { %1355 = shalt.err (!%p1352_p12)
}
 0x434   : > { %s1356_s13 = scalar_lea.hbm %s1740_s19, 128  ;;  %s1360_s29 = scalar_lea.hbm %s1833_s16, 256 }
 0x435   : > { %p1357_p13 = scmp.ne.s32.totalorder %s1740_s19, %s1356_s13  ;;  %p1361_p8 = scmp.lt.u32.totalorder %s1740_s19, %s1833_s16 }
 0x436   : > { %p1362_p9 = scmp.lt.u32.totalorder %s1360_s29, %s1356_s13  ;;  %p1364_p1 = scmp.lt.u32.totalorder %s1356_s13, %s1740_s19 }
 0x437   : > { %p1358_p2 = pnand %p1357_p13, %p1834_p4 }
 0x438   : > { %p1363_p0 = por %p1362_p9, %p1361_p8 }
 0x439   : > { %p1359_p7 = pneg %p1358_p2 }
 0x43a   : > { %p1365_p6 = por %p1364_p1, %p1363_p0 }
 0x43c   : > { %p1366_p10 = pnand %p1365_p6, %p1359_p7 }
 0x43e   : > { %1369 = shalt.err (!%p1366_p10)
}
 0x43f   : > { %1141 = dma.vmem_to_hbm [thread:$0]  (%p1834_p4), %s1742_s26, 128, %s1740_s19, %s885_s21  }
 0x440   : > { %p1835_p5 = scmp.eq.s32.totalorder %s1516_s25, 1 }
 0x442   : > { %1395 = dma.done.wait (%p1835_p5), [#allocation11], 256   ;;  %p1836_p11 = pmov %p1835_p5 }
 0x444   : > { %1397 = vsyncadd (%p1836_p11), [#allocation11], 4294967040 }
 0x445 PF: > { %s1837_s27 = sld [smem:[#allocation17_spill]]  ;;  %s1838_s28 = sld [smem:[#allocation20_spill]] }
 0x44b   : > { %s940_s10 = sand.u32 1, %s1837_s27   ;;  %p1839_p12 = scmp.ne.s32.totalorder %s1838_s28, 0 }
 0x44c   : > { %s941_s18 = scalar_lea.sflag [#allocation5], %s940_s10 }
 0x44d   : > { %p1159_p13 = pnand %p1041_p3, %p1839_p12 }
 0x44f   : > { %1399 = dma.done.wait (!%p1159_p13), %s941_s18, 128  }
 0x450   : > { %1401 = vsyncadd (!%p1159_p13), %s941_s18, 4294967168  ;;  %s1840_s24 = sld [smem:[#allocation18_spill]]  ;;  %s1841_s14 = sld [smem:[#allocation19_spill]] }
 0x451   : > { %s1842_s21 = smov %s1408_s22  ;;  %s1843_s22 = smov %s1412_s23 }
 0x456   : > { %p26_p4 = scmp.ge.s32.totalorder %s1840_s24, 4   ;;  %s1844_s23 = smov %s1841_s14 }
 0x458   :  { %28 = sbr.rel (!%p26_p4) target bundleno = 8 (0x8), region = 173 }
 0x45f   :  { %946 = vsyncpa [#allocation4], 1 }
 0x460   :  { %948 = vsyncpa [#allocation4 + $0x1], 1 }
 0x461   :  { %949 = vsyncpa [#allocation7], 1 }
 0x462   :  { %950 = vsyncpa [#allocation5], 1 }
 0x463   :  { %952 = vsyncpa [#allocation5 + $0x1], 1 }
 0x464   :  { %953 = vsyncpa [#allocation11], 1 }

</bundles_post_ra>
